<compile_context>
chip_gen: v7x
topology: tpu7x:2x2x1
jax: 0.10.0
libtpu: 0.0.40
codegen_flags: <defaults>
</compile_context>

<pallas_src>
import jax
import jax.numpy as jnp
from jax.experimental import pallas as pl
from jax.experimental.pallas import tpu as pltpu


NEG_SLOPE = 0.01  # nn.LeakyReLU() default


def _round_up(n, m):
    return ((n + m - 1) // m) * m


def _leaky_relu(x):
    return jnp.where(x > 0, x, NEG_SLOPE * x)


def mlp_kernel(x_ref, w0_ref, b0_ref, w1_ref, b1_ref, w2_ref, b2_ref, o_ref):
    """Fused 3-layer MLP: (Linear + LeakyReLU) x2 -> Linear.

    Matmul operands use the weight dtype (bf16 or f32); accumulation, bias add
    and LeakyReLU are f32.  Dropout(p=0) is the identity and is elided.
    """
    # Layer 0: Linear + LeakyReLU  (cast x to operand dtype in-kernel, no
    # wrapper-side copy of x)
    x = x_ref[...].astype(w0_ref.dtype)
    h = jnp.dot(x, w0_ref[...], preferred_element_type=jnp.float32)
    h = _leaky_relu(h + b0_ref[...])

    # Layer 1: Linear + LeakyReLU
    h = jnp.dot(h.astype(w1_ref.dtype), w1_ref[...],
                preferred_element_type=jnp.float32)
    h = _leaky_relu(h + b1_ref[...])

    # Final projection to latent_channels (no activation)
    h = jnp.dot(h.astype(w2_ref.dtype), w2_ref[...],
                preferred_element_type=jnp.float32) + b2_ref[...]

    o_ref[...] = h.astype(o_ref.dtype)


def prepare_params(params, *, use_bf16=True):
    """One-time cast of weights to the MXU operand dtype (biases stay f32).

    Hoisted out of the per-call path so the forward emits no extra XLA ops.
    params = [(w, b), ...] with w: (in, out), b: (1, out).
    """
    op_dtype = jnp.bfloat16 if use_bf16 else jnp.float32
    return [(w.astype(op_dtype), b.astype(jnp.float32)) for (w, b) in params]


def _choose_tile(B, tile_m):
    if B > tile_m:
        return tile_m
    if B > 512:
        # Split mid-size batches into >=2 blocks so the "parallel" batch axis
        # shards across both v7x TensorCores.
        return min(tile_m, _round_up(-(-B // 2), 256))
    # Small batch: single block, sublane-aligned.
    return max(8, _round_up(B, 8))


def enc_decoder_forward(x, prepared_params, *, tile_m=1024):
    """Fused EncDecoder forward.

    prepared_params: output of prepare_params() -- weights already in the
    operand dtype, biases f32, shapes w: (in, out), b: (1, out).
    x: (B, in_channels), any float dtype; output matches x.dtype.
    """
    (w0, b0), (w1, b1), (w2, b2) = prepared_params
    B, F_in = x.shape
    L = w2.shape[1]

    tm = _choose_tile(B, tile_m)
    grid = (pl.cdiv(B, tm),)

    def full(shape):
        # Whole-array block, constant index -> stays resident across the grid.
        return pl.BlockSpec(shape, lambda i: (0, 0))

    out = pl.pallas_call(
        mlp_kernel,
        out_shape=jax.ShapeDtypeStruct((B, L), x.dtype),
        grid=grid,
        in_specs=[
            # Last dim == full array dim -> exempt from the 128-lane rule.
            pl.BlockSpec((tm, F_in), lambda i: (i, 0)),   # x batch tile
            full(w0.shape), full(b0.shape),
            full(w1.shape), full(b1.shape),
            full(w2.shape), full(b2.shape),
        ],
        # Unpadded output block: (tm, L) with L == full latent dim.
        out_specs=pl.BlockSpec((tm, L), lambda i: (i, 0)),
        compiler_params=pltpu.CompilerParams(
            dimension_semantics=("parallel",),
            vmem_limit_bytes=32 * 1024 * 1024,
        ),
    )(x, w0, b0, w1, b1, w2, b2)

    return out


def init_params(key, in_channels, hidden_channels, latent_channels):
    dims = [in_channels] + list(hidden_channels) + [latent_channels]
    params = []
    for i in range(len(dims) - 1):
        key, kw, kb = jax.random.split(key, 3)
        fan_in = dims[i]
        scale = 1.0 / jnp.sqrt(fan_in)
        w = jax.random.uniform(kw, (dims[i], dims[i + 1]), jnp.float32,
                               minval=-scale, maxval=scale)
        b = jax.random.uniform(kb, (1, dims[i + 1]), jnp.float32,
                               minval=-scale, maxval=scale)
        params.append((w, b))
    return params


def reference_forward(x, params):
    h = x
    n = len(params)
    for i, (w, b) in enumerate(params):
        h = h @ w + b
        if i < n - 1:
            h = jnp.where(h > 0, h, NEG_SLOPE * h)
        # dropout p=0.0 -> identity
    return h


if __name__ == "__main__":
    # EncDecoder(in_channels=32, hidden_channels=[64, 64], latent_channels=16,
    #            dropout=0.0)
    in_channels = 32
    hidden_channels = [64, 64]
    latent_channels = 16
    batch = 16

    key = jax.random.PRNGKey(0)
    k_x, k_p, k_x2 = jax.random.split(key, 3)
    x = jax.random.normal(k_x, (batch, in_channels), jnp.float32)
    params = init_params(k_p, in_channels, hidden_channels, latent_channels)
    ref = reference_forward(x, params)

    params_f32 = prepare_params(params, use_bf16=False)
    params_bf16 = prepare_params(params, use_bf16=True)

    # f32 path (single-block launch): tight check vs. reference.
    out_f32 = jax.block_until_ready(enc_decoder_forward(x, params_f32))
    assert out_f32.shape == (batch, latent_channels)
    assert jnp.allclose(out_f32, ref, atol=1e-5, rtol=1e-5), "f32 mismatch"

    # bf16-operand path: loose check (bf16 matmul operands, f32 accumulation).
    out_bf16 = jax.block_until_ready(enc_decoder_forward(x, params_bf16))
    assert jnp.allclose(out_bf16, ref, atol=2e-2, rtol=2e-2), "bf16 mismatch"

    # Multi-block grid with a ragged last block (B not a multiple of tm).
    batch2 = 300
    x2 = jax.random.normal(k_x2, (batch2, in_channels), jnp.float32)
    ref2 = reference_forward(x2, params)
    out2 = jax.block_until_ready(
        enc_decoder_forward(x2, params_f32, tile_m=128))
    assert out2.shape == (batch2, latent_channels)
    assert jnp.allclose(out2, ref2, atol=1e-5, rtol=1e-5), "tiled mismatch"

    print("KERNEL_OK")
</pallas_src>

<mosaic_0001>
module attributes {stable_mosaic.version = 11 : i64} {
  func.func @mlp_kernel(%arg0: i32, %arg1: memref<16x32xf32, #tpu.memory_space<vmem>>, %arg2: memref<32x64xf32, #tpu.memory_space<vmem>>, %arg3: memref<1x64xf32, #tpu.memory_space<vmem>>, %arg4: memref<64x64xf32, #tpu.memory_space<vmem>>, %arg5: memref<1x64xf32, #tpu.memory_space<vmem>>, %arg6: memref<64x16xf32, #tpu.memory_space<vmem>>, %arg7: memref<1x16xf32, #tpu.memory_space<vmem>>, %arg8: memref<16x16xf32, #tpu.memory_space<vmem>>) attributes {dimension_semantics = [#tpu.dimension_semantics<parallel>], iteration_bounds = array<i64: 1>, scalar_prefetch = 0 : i64, scratch_operands = 0 : i64, tpu.core_type = #tpu.core_type<tc>, window_params = [{transform_indices = @transform_0, window_bounds = array<i64: 16, 32>}, {pipeline_mode = #tpu.pipeline_mode<synchronous>, transform_indices = @transform_1, window_bounds = array<i64: 32, 64>}, {pipeline_mode = #tpu.pipeline_mode<synchronous>, transform_indices = @transform_2, window_bounds = array<i64: 1, 64>}, {pipeline_mode = #tpu.pipeline_mode<synchronous>, transform_indices = @transform_3, window_bounds = array<i64: 64, 64>}, {pipeline_mode = #tpu.pipeline_mode<synchronous>, transform_indices = @transform_4, window_bounds = array<i64: 1, 64>}, {pipeline_mode = #tpu.pipeline_mode<synchronous>, transform_indices = @transform_5, window_bounds = array<i64: 64, 16>}, {pipeline_mode = #tpu.pipeline_mode<synchronous>, transform_indices = @transform_6, window_bounds = array<i64: 1, 16>}, {transform_indices = @transform_7, window_bounds = array<i64: 16, 16>}]} {
    %c0 = arith.constant 0 : index
    %c0_0 = arith.constant 0 : index
    %0 = vector.load %arg1[%c0, %c0_0] : memref<16x32xf32, #tpu.memory_space<vmem>>, vector<16x32xf32>
    %c0_1 = arith.constant 0 : index
    %c0_2 = arith.constant 0 : index
    %1 = vector.load %arg2[%c0_1, %c0_2] : memref<32x64xf32, #tpu.memory_space<vmem>>, vector<32x64xf32>
    %cst = arith.constant dense<0.000000e+00> : vector<16x64xf32>
    %2 = tpu.matmul %0, %1, %cst {dimension_numbers = #tpu.dot_dimension_numbers<[1], [0], [0], [1], [0, 0, 1, 1], [], []>} : vector<16x32xf32>, vector<32x64xf32>, vector<16x64xf32> -> vector<16x64xf32>
    %c0_3 = arith.constant 0 : index
    %c0_4 = arith.constant 0 : index
    %3 = vector.load %arg3[%c0_3, %c0_4] : memref<1x64xf32, #tpu.memory_space<vmem>>, vector<1x64xf32>
    %4 = vector.broadcast %3 : vector<1x64xf32> to vector<16x64xf32>
    %5 = arith.addf %2, %4 : vector<16x64xf32>
    %cst_5 = arith.constant 0.000000e+00 : f32
    %6 = vector.broadcast %cst_5 : f32 to vector<16x64xf32>
    %7 = arith.cmpf ogt, %5, %6 : vector<16x64xf32>
    %cst_6 = arith.constant 0.00999999977 : f32
    %8 = vector.broadcast %cst_6 : f32 to vector<16x64xf32>
    %9 = arith.mulf %8, %5 : vector<16x64xf32>
    %10 = arith.select %7, %5, %9 : vector<16x64xi1>, vector<16x64xf32>
    %c0_7 = arith.constant 0 : index
    %c0_8 = arith.constant 0 : index
    %11 = vector.load %arg4[%c0_7, %c0_8] : memref<64x64xf32, #tpu.memory_space<vmem>>, vector<64x64xf32>
    %cst_9 = arith.constant dense<0.000000e+00> : vector<16x64xf32>
    %12 = tpu.matmul %10, %11, %cst_9 {dimension_numbers = #tpu.dot_dimension_numbers<[1], [0], [0], [1], [0, 0, 1, 1], [], []>} : vector<16x64xf32>, vector<64x64xf32>, vector<16x64xf32> -> vector<16x64xf32>
    %c0_10 = arith.constant 0 : index
    %c0_11 = arith.constant 0 : index
    %13 = vector.load %arg5[%c0_10, %c0_11] : memref<1x64xf32, #tpu.memory_space<vmem>>, vector<1x64xf32>
    %14 = vector.broadcast %13 : vector<1x64xf32> to vector<16x64xf32>
    %15 = arith.addf %12, %14 : vector<16x64xf32>
    %cst_12 = arith.constant 0.000000e+00 : f32
    %16 = vector.broadcast %cst_12 : f32 to vector<16x64xf32>
    %17 = arith.cmpf ogt, %15, %16 : vector<16x64xf32>
    %cst_13 = arith.constant 0.00999999977 : f32
    %18 = vector.broadcast %cst_13 : f32 to vector<16x64xf32>
    %19 = arith.mulf %18, %15 : vector<16x64xf32>
    %20 = arith.select %17, %15, %19 : vector<16x64xi1>, vector<16x64xf32>
    %c0_14 = arith.constant 0 : index
    %c0_15 = arith.constant 0 : index
    %21 = vector.load %arg6[%c0_14, %c0_15] : memref<64x16xf32, #tpu.memory_space<vmem>>, vector<64x16xf32>
    %cst_16 = arith.constant dense<0.000000e+00> : vector<16x16xf32>
    %22 = tpu.matmul %20, %21, %cst_16 {dimension_numbers = #tpu.dot_dimension_numbers<[1], [0], [0], [1], [0, 0, 1, 1], [], []>} : vector<16x64xf32>, vector<64x16xf32>, vector<16x16xf32> -> vector<16x16xf32>
    %c0_17 = arith.constant 0 : index
    %c0_18 = arith.constant 0 : index
    %23 = vector.load %arg7[%c0_17, %c0_18] : memref<1x16xf32, #tpu.memory_space<vmem>>, vector<1x16xf32>
    %24 = vector.broadcast %23 : vector<1x16xf32> to vector<16x16xf32>
    %25 = arith.addf %22, %24 : vector<16x16xf32>
    %c0_19 = arith.constant 0 : index
    %c0_20 = arith.constant 0 : index
    %26 = vector.load %arg8[%c0_19, %c0_20] : memref<16x16xf32, #tpu.memory_space<vmem>>, vector<16x16xf32>
    tpu.vector_store %arg8[%c0_19, %c0_20], %25 {strides = array<i32>} : memref<16x16xf32, #tpu.memory_space<vmem>>, vector<16x16xf32>,
    return
  }
  func.func @transform_0(%arg0: i32) -> (i32, i32) {
    %c0_i32 = arith.constant 0 : i32
    %c0_i32_0 = arith.constant 0 : i32
    return %arg0, %c0_i32 : i32, i32
  }
  func.func @transform_1(%arg0: i32) -> (i32, i32) {
    %c0_i32 = arith.constant 0 : i32
    %c0_i32_0 = arith.constant 0 : i32
    %c0_i32_1 = arith.constant 0 : i32
    return %c0_i32, %c0_i32_0 : i32, i32
  }
  func.func @transform_2(%arg0: i32) -> (i32, i32) {
    %c0_i32 = arith.constant 0 : i32
    %c0_i32_0 = arith.constant 0 : i32
    %c0_i32_1 = arith.constant 0 : i32
    return %c0_i32, %c0_i32_0 : i32, i32
  }
  func.func @transform_3(%arg0: i32) -> (i32, i32) {
    %c0_i32 = arith.constant 0 : i32
    %c0_i32_0 = arith.constant 0 : i32
    %c0_i32_1 = arith.constant 0 : i32
    return %c0_i32, %c0_i32_0 : i32, i32
  }
  func.func @transform_4(%arg0: i32) -> (i32, i32) {
    %c0_i32 = arith.constant 0 : i32
    %c0_i32_0 = arith.constant 0 : i32
    %c0_i32_1 = arith.constant 0 : i32
    return %c0_i32, %c0_i32_0 : i32, i32
  }
  func.func @transform_5(%arg0: i32) -> (i32, i32) {
    %c0_i32 = arith.constant 0 : i32
    %c0_i32_0 = arith.constant 0 : i32
    %c0_i32_1 = arith.constant 0 : i32
    return %c0_i32, %c0_i32_0 : i32, i32
  }
  func.func @transform_6(%arg0: i32) -> (i32, i32) {
    %c0_i32 = arith.constant 0 : i32
    %c0_i32_0 = arith.constant 0 : i32
    %c0_i32_1 = arith.constant 0 : i32
    return %c0_i32, %c0_i32_0 : i32, i32
  }
  func.func @transform_7(%arg0: i32) -> (i32, i32) {
    %c0_i32 = arith.constant 0 : i32
    %c0_i32_0 = arith.constant 0 : i32
    return %arg0, %c0_i32 : i32, i32
  }
}

</mosaic_0001>

<bundles_post_ra>
// kernel: tpu_custom_call.1
= control target key start
LH: loop header
LB: loop body
LE: loop exit
PB: predicated region body
PF: predicated region fallthrough
CT: control target
= control target key end

     0   :  { %12 = vsyncpa [#allocation3], 0  ;;  %s680_s0 = inlined_call_operand.vmem [shape: f32[16,32], index: 0, kind: input, shape index: {}]   ;;  %s681_s1 = inlined_call_operand.hbm [shape: f32[32,64], index: 1, kind: input, shape index: {}]   ;;  %s682_s2 = inlined_call_operand.vmem [shape: f32[1,64], index: 2, kind: input, shape index: {}]   ;;  %s683_s3 = inlined_call_operand.vmem [shape: f32[64,64], index: 3, kind: input, shape index: {}]   ;;  %s684_s4 = inlined_call_operand.vmem [shape: f32[1,64], index: 4, kind: input, shape index: {}]   ;;  %s685_s5 = inlined_call_operand.vmem [shape: f32[64,16], index: 5, kind: input, shape index: {}]   ;;  %s686_s6 = inlined_call_operand.vmem [shape: f32[1,16], index: 6, kind: input, shape index: {}]   ;;  %s687_s7 = inlined_call_operand.hbm [shape: f32[16,16], index: 7, kind: output, shape index: {}]  }
   0x1   :  { %13 = vsyncpa [#allocation4], 0  ;;  %s537_s24 = smov [#allocation2]   ;;  %s489_s28 = scalar_lea.hbm %s681_s1, 512 }
   0x2   :  { %s21_s25 = sshll.u32 %s537_s24, 4  ;;  %p490_p0 = scmp.ne.s32.totalorder %s681_s1, %s489_s28  ;;  %s22_s25 = int_to_ptr.vmem [resolvable:$true] %s21_s25 }
   0x3   :  { %p493_p1 = scmp.lt.u32.totalorder %s489_s28, %s681_s1 }
   0x5   :  { %p495_p2 = pnand %p493_p1, %p490_p0 }
   0x7   :  { %498 = shalt.err (!%p495_p2)
}
   0x8   :  { %s499_s10 = scalar_lea.vmem %s22_s25, 512  ;;  %p504_p4 = scmp.lt.s32.totalorder %s22_s25, %s22_s25 }
   0x9   :  { %p500_p3 = scmp.ne.s32.totalorder %s22_s25, %s499_s10  ;;  %p505_p5 = scmp.lt.s32.totalorder %s499_s10, %s499_s10 }
   0xb   :  { %p506_p6 = por %p505_p5, %p504_p4 }
   0xd   :  { %p507_p7 = pnand %p506_p6, %p500_p3 }
   0xf   :  { %510 = shalt.err (!%p507_p7)
}
  0x10   :  { %s538_s11 = smov 128   ;;  %s539_s12 = smov 8  }
  0x11   :  { %27 = dma.hbm_to_vmem [thread:$0]  %s681_s1, 512, %s22_s25, [#allocation3], %s538_s11, %s538_s11, %s539_s12  }
  0x12   :  { %533 = dma.done.wait [#allocation3], 512  }
  0x13   :  { %534 = vsyncadd [#allocation3], 4294966784  ;;  %vm54_vm0 = vcmask 261120   ;;  %v43_v0 = vld [vmem:[#allocation2] sm:$0xff]  ;;  %v44_v1 = vld [vmem:[#allocation2 + $0x8] sm:$0xff]  ;;  %vm157_vm3 = vcmask 523264  }
  0x14   :  { %v45_v2 = vld [vmem:[#allocation2 + $0x10] sm:$0xff]  ;;  %v445_v3 = vpack.c.bf16 %v44_v1, %v43_v0  ;;  %v46_v4 = vld [vmem:[#allocation2 + $0x18] sm:$0xff]  ;;  %v41_v5 = vld [vmem:[%s680_s0] sm:$0xff]  ;;  %s540_s30 = smov [#allocation5]   ;;  %vm341_vm6 = vcmask 130048  }
  0x15   :  { %v449_v6 = vpack.c.bf16 %v46_v4, %v45_v2  ;;  %404 = vmatprep.mubr.msk.f32.mxu0 %vm54_vm0, %v41_v5  ;;  %v142_v7 = vld [vmem:[%s683_s3] sm:$0xff]  ;;  %v143_v8 = vld [vmem:[%s683_s3 + $0x8] sm:$0xff]  ;;  %v144_v9 = vld [vmem:[%s683_s3 + $0x10] sm:$0xff] }
  0x16   :  { %446 = vmatprep.subr.bf16.mxu0 %v445_v3  ;;  %v453_v10 = vpack.c.bf16 %v143_v8, %v142_v7  ;;  %v145_v11 = vld [vmem:[%s683_s3 + $0x18] sm:$0xff]  ;;  %v42_v13 = vld [vmem:[%s680_s0 + $0x8] sm:$0xff]  ;;  %v146_v14 = vld [vmem:[%s683_s3 + $0x20] sm:$0xff] }
  0x17   :  { %448 = vmatpush3.bf16.msra.mxu0 %v445_v3  ;;  %v457_v12 = vpack.c.bf16 %v145_v11, %v144_v9  ;;  %v147_v15 = vld [vmem:[%s683_s3 + $0x28] sm:$0xff]  ;;  %v148_v17 = vld [vmem:[%s683_s3 + $0x30] sm:$0xff]  ;;  %v149_v18 = vld [vmem:[%s683_s3 + $0x38] sm:$0xff] }
  0x18   :  { %450 = vmatprep.subr.bf16.mxu0 %v449_v6  ;;  %454 = vmatprep.subr.bf16.mxu1 %v453_v10  ;;  %v461_v16 = vpack.c.bf16 %v147_v15, %v146_v14  ;;  %v465_v19 = vpack.c.bf16 %v149_v18, %v148_v17  ;;  %v245_v20 = vld [vmem:[%s685_s5] sm:$0xff]  ;;  %v246_v21 = vld [vmem:[%s685_s5 + $0x8] sm:$0xff]  ;;  %v247_v22 = vld [vmem:[%s685_s5 + $0x10] sm:$0xff] }
  0x19   :  { %456 = vmatpush3.bf16.msra.mxu1 %v453_v10  ;;  %v469_v23 = vpack.c.bf16 %v246_v21, %v245_v20  ;;  %v248_v24 = vld [vmem:[%s685_s5 + $0x18] sm:$0xff]  ;;  %v361_v26 = vld [vmem:[%s682_s2] ss:$0 sm:$0xff]  ;;  %v250_v36 = vld [vmem:[%s685_s5 + $0x28] sm:$0xff] }
  0x1a   :  { %458 = vmatprep.subr.bf16.mxu1 %v457_v12  ;;  %v473_v25 = vpack.c.bf16 %v248_v24, %v247_v22  ;;  %v249_v35 = vld [vmem:[%s685_s5 + $0x20] sm:$0xff]  ;;  %v251_v38 = vld [vmem:[%s685_s5 + $0x30] sm:$0xff]  ;;  %v252_v39 = vld [vmem:[%s685_s5 + $0x38] sm:$0xff] }
  0x1b   :  { %452 = vmatpush3.bf16.msra.mxu0 %v449_v6  ;;  %v477_v37 = vpack.c.bf16 %v250_v36, %v249_v35  ;;  %v481_v40 = vpack.c.bf16 %v252_v39, %v251_v38  ;;  %v364_v41 = vld [vmem:[%s684_s4] ss:$0 sm:$0xff]  ;;  %s349_s4 = sshll.u32 %s540_s30, 4  ;;  %s350_s4 = int_to_ptr.vmem [resolvable:$true] %s349_s4 }
  0x1c   :  { %470 = vmatprep.subr.bf16.mxu0 %v469_v23  ;;  %v367_v50 = vld [vmem:[%s686_s6] ss:$0 sm:$0xff]  ;;  %s511_s8 = scalar_lea.vmem %s350_s4, 256  ;;  %p516_p9 = scmp.lt.s32.totalorder %s350_s4, %s350_s4 }
  0x1d   :  { %460 = vmatpush3.bf16.msra.mxu1 %v457_v12  ;;  %p512_p8 = scmp.ne.s32.totalorder %s350_s4, %s511_s8  ;;  %p517_p10 = scmp.lt.s32.totalorder %s511_s8, %s511_s8 }
  0x1e   :  { %405 = vmatmul.mubr.msk.f32.vlgmr.msra.gmra.mrb[0].mxu0 %vm54_vm0, %v42_v13  ;;  %462 = vmatprep.subr.bf16.mxu1 %v461_v16 }
  0x1f   :  { %472 = vmatpush3.bf16.msra.mxu0 %v469_v23  ;;  %p518_p11 = por %p517_p10, %p516_p9 }
  0x20   :  { %474 = vmatprep.subr.bf16.mxu0 %v473_v25 }
  0x21   :  { %464 = vmatpush3.bf16.msra.mxu1 %v461_v16  ;;  %p519_p12 = pnand %p518_p11, %p512_p8 }
  0x22   :  { %466 = vmatprep.subr.bf16.mxu1 %v465_v19 }
  0x23   :  { %476 = vmatpush3.bf16.msra.mxu0 %v473_v25 }
  0x24   :  { %478 = vmatprep.subr.bf16.mxu0 %v477_v37 }
  0x25   :  { %468 = vmatpush3.bf16.msra.mxu1 %v465_v19 }
  0x27   :  { %480 = vmatpush3.bf16.msra.mxu0 %v477_v37 }
  0x28   :  { %482 = vmatprep.subr.bf16.mxu0 %v481_v40 }
  0x2b   :  { %484 = vmatpush3.bf16.msra.mxu0 %v481_v40 }
  0xf1   :  { %v406_v27 = vpop.f32.mrb[0].mxu0 }
  0xf2   :  { %v133_v28 = vadd.f32 %v406_v27, %v361_v26  ;;  %v127_v29 = vpop.f32.mrb[1].mxu0 }
  0xf3   :  { %v128_v30 = vadd.f32 %v361_v26, %v127_v29 }
  0xf4   :  { %v139_v31 = vmul.f32 0.01, %v133_v28  ;;  %vm137_vm1 = vcmp.gt.f32.partialorder %v133_v28, 0.0 }
  0xf5   :  { %vm136_vm2 = vcmp.gt.f32.partialorder %v128_v30, 0.0  ;;  %v138_v32 = vmul.f32 0.01, %v128_v30 }
  0xf6   :  { %v141_v34 = vsel %vm137_vm1, %v133_v28, %v139_v31 }
  0xf7   :  { %v140_v33 = vsel %vm136_vm2, %v128_v30, %v138_v32 }
  0xf8   :  { %423 = vmatprep.mubr.msk.f32.mxu1 %vm157_vm3, %v140_v33 }
  0xf9   :  { %424 = vmatmul.mubr.msk.f32.vlgmr.msra.gmra.mrb[0].mxu1 %vm157_vm3, %v141_v34 }
 0x1cc   :  { %v425_v42 = vpop.f32.mrb[0].mxu1 }
 0x1cd   :  { %v236_v43 = vadd.f32 %v425_v42, %v364_v41  ;;  %v230_v44 = vpop.f32.mrb[1].mxu1 }
 0x1ce   :  { %v231_v45 = vadd.f32 %v364_v41, %v230_v44 }
 0x1cf   :  { %v242_v46 = vmul.f32 0.01, %v236_v43  ;;  %vm240_vm4 = vcmp.gt.f32.partialorder %v236_v43, 0.0 }
 0x1d0   :  { %vm239_vm5 = vcmp.gt.f32.partialorder %v231_v45, 0.0  ;;  %v241_v47 = vmul.f32 0.01, %v231_v45 }
 0x1d1   :  { %v244_v49 = vsel %vm240_vm4, %v236_v43, %v242_v46 }
 0x1d2   :  { %v243_v48 = vsel %vm239_vm5, %v231_v45, %v241_v47 }
 0x1d3   :  { %442 = vmatprep.mubr.msk.f32.mxu0 %vm157_vm3, %v243_v48 }
 0x1d4   :  { %443 = vmatmul.mubr.msk.f32.vlgmr.msra.gmra.mrb[2].mxu0 %vm157_vm3, %v244_v49 }
 0x2a7   :  { %v444_v51 = vpop.f32.mrb[2].mxu0 }
 0x2a8   :  { %v338_v52 = vadd.f32 %v444_v51, %v367_v50  ;;  %v332_v53 = vpop.f32.mrb[3].mxu0 }
 0x2a9   :  { %v333_v54 = vadd.f32 %v367_v50, %v332_v53 }
 0x2aa   :  { %343 = vst.msk [vmem:[#allocation5 + $0x8] sm:$0xff] %vm341_vm6, %v338_v52 }
 0x2ab   :  { %342 = vst.msk [vmem:[#allocation5] sm:$0xff] %vm341_vm6, %v333_v54 }
 0x2ac   :  { %522 = shalt.err (!%p519_p12)
}
 0x2ad   :  { %s523_s6 = scalar_lea.hbm %s687_s7, 256 }
 0x2ae   :  { %p524_p13 = scmp.ne.s32.totalorder %s687_s7, %s523_s6  ;;  %p527_p0 = scmp.lt.u32.totalorder %s523_s6, %s687_s7 }
 0x2b0   :  { %p529_p1 = pnand %p527_p0, %p524_p13 }
 0x2b2   :  { %532 = shalt.err (!%p529_p1)
}
 0x2b3   :  { %355 = dma.vmem_to_hbm [thread:$0]  %s350_s4, 256, %s687_s7, [#allocation4], %s538_s11, %s538_s11, %s539_s12  }
 0x2b4   :  { %535 = dma.done.wait [#allocation4], 256  }
 0x2b5   :  { %536 = vsyncadd [#allocation4], 4294967040 }
 0x2b6   :  { %359 = vsyncpa [#allocation3], 1 }
 0x2b7   :  { %360 = vsyncpa [#allocation4], 1 }

</bundles_post_ra>
